<compile_context>
chip_gen: v7x
topology: tpu7x:2x2x1
jax: 0.10.0
libtpu: 0.0.40
codegen_flags: <defaults>
</compile_context>

<pallas_src>
import functools

import jax
import jax.numpy as jnp
from jax.experimental import pallas as pl
from jax.experimental.pallas import tpu as pltpu

# ---- model hyper-parameters (from the PyTorch script) ----
EMBEDDING_SIZE = 2
FILTER_SIZES = (2, 2, 2)          # all equal -> weights can be stacked
NUM_CLASSES = 2
NUM_FILTERS = 3
SEQUENCE_LENGTH = 3
VOCAB_SIZE = 16                   # synthetic word_dict size
NUM_FILTERS_TOTAL = NUM_FILTERS * len(FILTER_SIZES)


def _cnn_kernel(x_ref, w_emb_ref, convw_ref, fcw_ref, out_ref, *,
                batch, seq_len, n_pos, filter_size, emb_size, vocab):
    """Fused embed(one-hot matmul) -> im2col(values) -> conv -> ReLU -> max -> FC.

    x_ref     : [B, S]            int32  token ids (VMEM)
    w_emb_ref : [V, E]            f32    embedding table (VMEM)
    convw_ref : [fs*E + 1, C*F]   f32    stacked conv weights + bias row
    fcw_ref   : [C*F + 1, NC]     f32    classifier weight + bias row
    out_ref   : [B, NC]           f32    logits
    """
    ids = x_ref[...]                                                # [B, S] i32
    iota_v = jax.lax.broadcasted_iota(jnp.int32, (batch, vocab), 1)  # [B, V]

    # 1) One-hot gather on the MXU.  Rows ordered (s, b): row s*B + b is the
    #    embedding of token (b, s).  OOB ids simply produce a zero row.
    onehot = jnp.concatenate(
        [(iota_v == ids[:, s:s + 1]).astype(jnp.float32) for s in range(seq_len)],
        axis=0)                                                      # [S*B, V]
    emb_all = jnp.dot(onehot, w_emb_ref[...],
                      preferred_element_type=jnp.float32)            # [S*B, E]
    emb_blocks = [emb_all[s * batch:(s + 1) * batch, :]              # each [B, E]
                  for s in range(seq_len)]

    # 2) im2col windows assembled from static slices (values stay in vregs).
    #    A ones column folds the conv bias into the matmul.
    ones_b = jnp.ones((batch, 1), jnp.float32)
    windows = jnp.concatenate(
        [jnp.concatenate([emb_blocks[t + k] for k in range(filter_size)]
                         + [ones_b], axis=1)                          # [B, fs*E+1]
         for t in range(n_pos)],
        axis=0)                                                      # [n_pos*B, fs*E+1]

    # 3) ONE conv matmul covering all branches/taps/positions (+bias) + ReLU.
    h = jnp.maximum(jnp.dot(windows, convw_ref[...],
                            preferred_element_type=jnp.float32), 0.0)  # [n_pos*B, C*F]

    # 4) Max-over-time with static row-block slices (rows are position-major).
    pooled = h[0:batch, :]
    for t in range(1, n_pos):
        pooled = jnp.maximum(pooled, h[t * batch:(t + 1) * batch, :])

    # 5) Classifier matmul with the FC bias folded in via a ones column.
    #    NC=2 -> a single masked partial store; negligible with one grid step.
    pooled_aug = jnp.concatenate([pooled, ones_b], axis=1)           # [B, C*F+1]
    out_ref[...] = jnp.dot(pooled_aug, fcw_ref[...],
                           preferred_element_type=jnp.float32)


def cnn_forward(X, W_emb, conv_w, conv_b, fc_w, fc_b):
    """X: [B, S] int32 token ids. Returns logits [B, NUM_CLASSES]."""
    B, S = X.shape
    C = len(FILTER_SIZES)
    fs = FILTER_SIZES[0]
    # Weight stacking below requires equal filter sizes (true for this model).
    assert all(f == fs for f in FILTER_SIZES)
    n_pos = S - fs + 1
    CF = C * NUM_FILTERS

    # Static weight re-packing (trace-time; XLA folds it).  Column order is
    # (branch, filter) = (c, f), matching the PyTorch concat order, so fc_w
    # is usable unchanged.  Biases are appended as an extra weight row so
    # they ride along inside the matmuls (folded bias).
    convw_packed = jnp.transpose(conv_w, (1, 2, 0, 3)).reshape(
        fs * EMBEDDING_SIZE, CF)
    convw_aug = jnp.concatenate(
        [convw_packed, conv_b.reshape(1, CF)], axis=0).astype(jnp.float32)
    fcw_aug = jnp.concatenate(
        [fc_w.astype(jnp.float32), fc_b.reshape(1, NUM_CLASSES)], axis=0)

    kernel = functools.partial(
        _cnn_kernel, batch=B, seq_len=S, n_pos=n_pos, filter_size=fs,
        emb_size=EMBEDDING_SIZE, vocab=VOCAB_SIZE)

    vmem = pl.BlockSpec(memory_space=pltpu.MemorySpace.VMEM)
    flops = (2 * B * S * VOCAB_SIZE * EMBEDDING_SIZE            # one-hot gather
             + 2 * n_pos * B * (fs * EMBEDDING_SIZE + 1) * CF   # conv
             + 2 * B * (CF + 1) * NUM_CLASSES)                  # classifier
    bytes_accessed = 4 * (X.size + W_emb.size + convw_aug.size
                          + fcw_aug.size + B * NUM_CLASSES)

    # TODO(synk): if batch is ever scaled up, add a leading batch grid axis
    # marked "parallel" (tile B in multiples of 8).  Size the per-step block
    # for the chip: v6e tolerates >=512-row tiles under its 32 MiB scoped /
    # 128 MiB physical VMEM (raise vmem_limit_bytes if needed); v7x has only
    # 64 MiB physical VMEM but 2 TensorCores, so use ~half the v6e tile and
    # rely on the parallel axis; v5e's scoped default is 16 MiB.  Keep the
    # elementwise path in f32 (v5e VPU/EUP have no bf16).
    return pl.pallas_call(
        kernel,
        out_shape=jax.ShapeDtypeStruct((B, NUM_CLASSES), jnp.float32),
        in_specs=[vmem] * 4,
        out_specs=vmem,
        cost_estimate=pl.CostEstimate(flops=flops, transcendentals=0,
                                      bytes_accessed=bytes_accessed),
    )(X.astype(jnp.int32), W_emb.astype(jnp.float32), convw_aug, fcw_aug)


def cnn_reference(X, W_emb, conv_w, conv_b, fc_w, fc_b):
    """Pure-JAX reference of the same forward pass (for verification)."""
    emb = jnp.take(W_emb, X, axis=0)                      # [B, S, E]
    pooled_all = []
    for c, fs in enumerate(FILTER_SIZES):
        n_pos = SEQUENCE_LENGTH - fs + 1
        per_t = []
        for t in range(n_pos):
            s = sum(emb[:, t + k, :] @ conv_w[c, k] for k in range(fs))
            per_t.append(jax.nn.relu(s + conv_b[c]))
        pooled_all.append(jnp.max(jnp.stack(per_t, 0), axis=0))   # [B, F]
    h_pool_flat = jnp.concatenate(pooled_all, axis=1)             # [B, C*F]
    return h_pool_flat @ fc_w + fc_b


if __name__ == "__main__":
    key = jax.random.PRNGKey(0)
    k_emb, k_cw, k_cb, k_fw, k_x = jax.random.split(key, 5)

    B = 4  # batch
    # Parameters (deterministic synthetic init, shapes match the module).
    W_emb = jax.random.uniform(k_emb, (VOCAB_SIZE, EMBEDDING_SIZE),
                               jnp.float32, -1.0, 1.0)
    # conv weights: [n_convs, filter_size, E, F]; biases: [n_convs, 1, F]
    conv_w = jax.random.uniform(k_cw, (len(FILTER_SIZES), FILTER_SIZES[0],
                                       EMBEDDING_SIZE, NUM_FILTERS),
                                jnp.float32, -0.5, 0.5)
    conv_b = jax.random.uniform(k_cb, (len(FILTER_SIZES), 1, NUM_FILTERS),
                                jnp.float32, -0.5, 0.5)
    # final linear: Weight [num_filters_total, num_classes] (PyTorch concat
    # order is branch-major, filter-minor), Bias = 0.1 * ones as in the module.
    fc_w = jax.random.uniform(k_fw, (NUM_FILTERS_TOTAL, NUM_CLASSES),
                              jnp.float32, -1.0, 1.0)
    fc_b = 0.1 * jnp.ones((1, NUM_CLASSES), jnp.float32)

    # Input: token-id sentences [B, sequence_length].
    X = jax.random.randint(k_x, (B, SEQUENCE_LENGTH), 0, VOCAB_SIZE,
                           dtype=jnp.int32)

    out = cnn_forward(X, W_emb, conv_w, conv_b, fc_w, fc_b)
    out = jax.block_until_ready(out)

    ref = cnn_reference(X, W_emb, conv_w, conv_b, fc_w, fc_b)
    assert out.shape == (B, NUM_CLASSES)
    assert jnp.allclose(out, ref, atol=1e-5, rtol=1e-5), (out, ref)

    print("KERNEL_OK")
</pallas_src>

<mosaic_0001>
module attributes {stable_mosaic.version = 11 : i64} {
  func.func @_cnn_kernel(%arg0: memref<4x3xi32, #tpu.memory_space<vmem>>, %arg1: memref<16x2xf32, #tpu.memory_space<vmem>>, %arg2: memref<5x9xf32, #tpu.memory_space<vmem>>, %arg3: memref<10x2xf32, #tpu.memory_space<vmem>>, %arg4: memref<4x2xf32, #tpu.memory_space<vmem>>) attributes {dimension_semantics = [], scalar_prefetch = 0 : i64, scratch_operands = 0 : i64, tpu.core_type = #tpu.core_type<tc>} {
    %c0 = arith.constant 0 : index
    %c0_0 = arith.constant 0 : index
    %0 = vector.load %arg0[%c0, %c0_0] : memref<4x3xi32, #tpu.memory_space<vmem>>, vector<4x3xi32>
    %1 = tpu.iota {dimensions = array<i32: 1>} : vector<4x16xi32>
    %2 = vector.extract_strided_slice %0 {offsets = [0, 0], sizes = [4, 1], strides = [1, 1]} : vector<4x3xi32> to vector<4x1xi32>
    %3 = vector.broadcast %2 : vector<4x1xi32> to vector<4x16xi32>
    %4 = arith.cmpi eq, %1, %3 : vector<4x16xi32>
    %5 = arith.extui %4 : vector<4x16xi1> to vector<4x16xi32>
    %6 = arith.sitofp %5 : vector<4x16xi32> to vector<4x16xf32>
    %7 = vector.extract_strided_slice %0 {offsets = [0, 1], sizes = [4, 1], strides = [1, 1]} : vector<4x3xi32> to vector<4x1xi32>
    %8 = vector.broadcast %7 : vector<4x1xi32> to vector<4x16xi32>
    %9 = arith.cmpi eq, %1, %8 : vector<4x16xi32>
    %10 = arith.extui %9 : vector<4x16xi1> to vector<4x16xi32>
    %11 = arith.sitofp %10 : vector<4x16xi32> to vector<4x16xf32>
    %12 = vector.extract_strided_slice %0 {offsets = [0, 2], sizes = [4, 1], strides = [1, 1]} : vector<4x3xi32> to vector<4x1xi32>
    %13 = vector.broadcast %12 : vector<4x1xi32> to vector<4x16xi32>
    %14 = arith.cmpi eq, %1, %13 : vector<4x16xi32>
    %15 = arith.extui %14 : vector<4x16xi1> to vector<4x16xi32>
    %16 = arith.sitofp %15 : vector<4x16xi32> to vector<4x16xf32>
    %17 = tpu.concatenate %6, %11, %16 in 0 : vector<4x16xf32>, vector<4x16xf32>, vector<4x16xf32> -> vector<12x16xf32>
    %c0_1 = arith.constant 0 : index
    %c0_2 = arith.constant 0 : index
    %18 = vector.load %arg1[%c0_1, %c0_2] : memref<16x2xf32, #tpu.memory_space<vmem>>, vector<16x2xf32>
    %cst = arith.constant dense<0.000000e+00> : vector<12x2xf32>
    %19 = tpu.matmul %17, %18, %cst {dimension_numbers = #tpu.dot_dimension_numbers<[1], [0], [0], [1], [0, 0, 1, 1], [], []>} : vector<12x16xf32>, vector<16x2xf32>, vector<12x2xf32> -> vector<12x2xf32>
    %20 = vector.extract_strided_slice %19 {offsets = [0, 0], sizes = [4, 2], strides = [1, 1]} : vector<12x2xf32> to vector<4x2xf32>
    %21 = vector.extract_strided_slice %19 {offsets = [4, 0], sizes = [4, 2], strides = [1, 1]} : vector<12x2xf32> to vector<4x2xf32>
    %22 = vector.extract_strided_slice %19 {offsets = [8, 0], sizes = [4, 2], strides = [1, 1]} : vector<12x2xf32> to vector<4x2xf32>
    %cst_3 = arith.constant 1.000000e+00 : f32
    %23 = vector.broadcast %cst_3 : f32 to vector<4x1xf32>
    %24 = tpu.concatenate %20, %21, %23 in 1 : vector<4x2xf32>, vector<4x2xf32>, vector<4x1xf32> -> vector<4x5xf32>
    %25 = tpu.concatenate %21, %22, %23 in 1 : vector<4x2xf32>, vector<4x2xf32>, vector<4x1xf32> -> vector<4x5xf32>
    %26 = tpu.concatenate %24, %25 in 0 : vector<4x5xf32>, vector<4x5xf32> -> vector<8x5xf32>
    %c0_4 = arith.constant 0 : index
    %c0_5 = arith.constant 0 : index
    %27 = vector.load %arg2[%c0_4, %c0_5] : memref<5x9xf32, #tpu.memory_space<vmem>>, vector<5x9xf32>
    %cst_6 = arith.constant dense<0.000000e+00> : vector<8x9xf32>
    %28 = tpu.matmul %26, %27, %cst_6 {dimension_numbers = #tpu.dot_dimension_numbers<[1], [0], [0], [1], [0, 0, 1, 1], [], []>} : vector<8x5xf32>, vector<5x9xf32>, vector<8x9xf32> -> vector<8x9xf32>
    %cst_7 = arith.constant 0.000000e+00 : f32
    %29 = vector.broadcast %cst_7 : f32 to vector<8x9xf32>
    %30 = arith.maximumf %28, %29 : vector<8x9xf32>
    %31 = vector.extract_strided_slice %30 {offsets = [0, 0], sizes = [4, 9], strides = [1, 1]} : vector<8x9xf32> to vector<4x9xf32>
    %32 = vector.extract_strided_slice %30 {offsets = [4, 0], sizes = [4, 9], strides = [1, 1]} : vector<8x9xf32> to vector<4x9xf32>
    %33 = arith.maximumf %31, %32 : vector<4x9xf32>
    %34 = tpu.concatenate %33, %23 in 1 : vector<4x9xf32>, vector<4x1xf32> -> vector<4x10xf32>
    %c0_8 = arith.constant 0 : index
    %c0_9 = arith.constant 0 : index
    %35 = vector.load %arg3[%c0_8, %c0_9] : memref<10x2xf32, #tpu.memory_space<vmem>>, vector<10x2xf32>
    %cst_10 = arith.constant dense<0.000000e+00> : vector<4x2xf32>
    %36 = tpu.matmul %34, %35, %cst_10 {dimension_numbers = #tpu.dot_dimension_numbers<[1], [0], [0], [1], [0, 0, 1, 1], [], []>} : vector<4x10xf32>, vector<10x2xf32>, vector<4x2xf32> -> vector<4x2xf32>
    %c0_11 = arith.constant 0 : index
    %c0_12 = arith.constant 0 : index
    %37 = vector.load %arg4[%c0_11, %c0_12] : memref<4x2xf32, #tpu.memory_space<vmem>>, vector<4x2xf32>
    tpu.vector_store %arg4[%c0_11, %c0_12], %36 {strides = array<i32>} : memref<4x2xf32, #tpu.memory_space<vmem>>, vector<4x2xf32>,
    return
  }
}

</mosaic_0001>

<bundles_post_ra>
// kernel: tpu_custom_call.1
= control target key start
LH: loop header
LB: loop body
LE: loop exit
PB: predicated region body
PF: predicated region fallthrough
CT: control target
= control target key end

     0   :  { %v373_v0 = vmov 1   ;;  %v374_v2 = vmov 2   ;;  %v375_v3 = vmov 0.0   ;;  %v376_v7 = vmov 0   ;;  %s378_s21 = smov 2   ;;  %s431_s0 = inlined_call_operand.vmem [shape: s32[4,3], index: 0, kind: input, shape index: {}]   ;;  %s432_s1 = inlined_call_operand.vmem [shape: f32[16,2], index: 1, kind: input, shape index: {}]   ;;  %s433_s2 = inlined_call_operand.vmem [shape: f32[5,9], index: 2, kind: input, shape index: {}]   ;;  %s434_s3 = inlined_call_operand.vmem [shape: f32[10,2], index: 3, kind: input, shape index: {}]   ;;  %s435_s4 = inlined_call_operand.vmem [shape: f32[4,2], index: 4, kind: output, shape index: {}]  }
   0x1   :  { %369 = vset.pattern.permute.xlu0 %v373_v0  ;;  %v17_v1 = vld [vmem:[%s431_s0] sm:$0xf]  ;;  %371 = vset.pattern.permute.xlu1 %v374_v2  ;;  %v44_v5 = vld [vmem:[%s432_s1 + $0x8] sm:$0xff]  ;;  %v18_v8 = vlaneseq  ;;  %vm41_vm2 = vcmask 1043456   ;;  %vm45_vm4 = vcmask 130048   ;;  %vm149_vm5 = vcmask 1044480  }
   0x2   :  { %27 = vperm.xlu0 %369, %v17_v1   ;;  %33 = vperm.xlu1 %371, %v17_v1   ;;  %v43_v4 = vld [vmem:[%s432_s1] sm:$0xff]  ;;  %vm377_vm6 = vmmov 0   ;;  %vm132_vm7 = vcmask 15360   ;;  %vm134_vm8 = vcmask 31744   ;;  %vm145_vm9 = vcmask 39936  }
   0x3   :  { %341 = vmatprep.subr.mxu1 %v375_v3  ;;  %v353_v6 = vpack.c.bf16 %v44_v5, %v43_v4  ;;  %v19_v9 = vand.u32 127, %v18_v8  ;;  %v144_v18 = vld [vmem:[%s433_s2] sm:$0x1f]  ;;  %343 = vmatprep.mubr.msk.f32.mxu1 %vm377_vm6, %v375_v3  ;;  %v231_v31 = vld [vmem:[%s434_s3 + $0x8] sm:$0x3]  ;;  %vm236_vm10 = vcmask 1041408  }
   0x4   :  { %342 = vmatpush3.msk.msra.mxu1 %vm149_vm5, %v144_v18  ;;  %v230_v30 = vld [vmem:[%s434_s3] sm:$0xff]  ;;  %v379_v33 = vmov 0.0|0.0   ;;  %vm380_vm11 = vmmov 1   ;;  %vm228_vm13 = vcmask 72704   ;;  %vm232_vm14 = vcmask 80896  }
   0x5   :  { %354 = vmatprep.subr.bf16.mxu0 %v353_v6  ;;  %v358_v32 = vpack.c.bf16 %v231_v31, %v230_v30  ;;  %357 = vmatprep.subr.bf16.mxu1 %v379_v33  ;;  %vm359_vm12 = vmpackc.low %vm236_vm10, %vm380_vm11  ;;  %vm310_vm15 = vcmask 11264  }
   0x6   :  { %370 = vset.pattern.permute.xlu0 %v376_v7  ;;  %356 = vmatpush3.bf16.msra.mxu0 %v353_v6 }
   0x7   :  { %21 = vperm.xlu0 %370, %v17_v1  }
   0xb   :  { %372 = vset.pattern.permute.xlu0 %v374_v2 }
  0x81   :  { %v28_v10 = vpop.permute.xlu0 %27  ;;  %v34_v11 = vpop.permute.xlu1 %33 }
  0x82   :  { %vm29_vm0 = vcmp.eq.s32.totalorder %v19_v9, %v28_v10  ;;  %vm35_vm1 = vcmp.eq.s32.totalorder %v19_v9, %v34_v11 }
  0x83   :  { %v317_v12 = vsel %vm29_vm0, 1.0, %v375_v3  ;;  %v318_v16 = vsel %vm35_vm1, 1.0, %v375_v3 }
  0x84   :  { %v39_v14 = vrot.slane %v317_v12, 4 }
  0x86   :  { %v22_v13 = vpop.permute.xlu0 %21 }
  0x87   :  { %vm23_vm3 = vcmp.eq.s32.totalorder %v19_v9, %v22_v13 }
  0x88   :  { %v316_v15 = vsel %vm23_vm3, 1.0, %v375_v3 }
  0x89   :  { %v42_v17 = vsel %vm41_vm2, %v316_v15, %v39_v14 }
  0x8a   :  { %338 = vmatprep.mubr.msk.f32.mxu0 %vm45_vm4, %v42_v17 }
  0x8b   :  { %339 = vmatmul.mubr.msk.f32.vlgmr.msra.gmra.mrb[0].mxu0 %vm45_vm4, %v318_v16 }
 0x15e   :  { %v340_v19 = vpop.f32.mrb[0].mxu0 }
 0x15f   :  { %v118_v20 = vpop.f32.mrb[1].mxu0  ;;  %v137_v22 = vrot.slane %v340_v19, 4 }
 0x160   :  { %v128_v21 = vrot.slane %v118_v20, 4 }
 0x162   :  { %129 = vrot.lane.b32.xlu1 %v128_v21, %s378_s21 }
 0x166   :  { %138 = vrot.lane.b32.xlu1 %v137_v22, %s378_s21 }
 0x1d4   :  { %v130_v23 = vpop.permute.xlu1 %129 }
 0x1d5   :  { %v133_v24 = vsel %vm132_vm7, %v118_v20, %v130_v23 }
 0x1d6   :  { %v135_v27 = vsel %vm134_vm8, %v133_v24, 1.0 }
 0x1d8   :  { %v139_v25 = vpop.permute.xlu1 %138 }
 0x1d9   :  { %v141_v26 = vsel %vm132_vm7, %v118_v20, %v139_v25 }
 0x1da   :  { %v142_v28 = vsel %vm134_vm8, %v141_v26, 1.0 }
 0x1db   :  { %v143_v29 = vsel %vm41_vm2, %v135_v27, %v142_v28 }
 0x1dc   :  { %344 = vmatmul.mubr.msk.f32.vlgmr.msra.gmra.mrb[0].mxu1 %vm145_vm9, %v143_v29 }
 0x1dd   :  { %350 = vmatprep.mubr.msk.f32.mxu1 %vm377_vm6, %v375_v3  ;;  %360 = vmatpush3.bf16.msk.msra.mxu1 %vm359_vm12, %v358_v32 }
 0x2af   :  { %v219_v34 = vpop.f32.mrb[0].mxu1 }
 0x2b0   :  { %v223_v35 = vmax.f32 %v219_v34, 0.0  ;;  %v345_v36 = vpop.f32.mrb[1].mxu1 }
 0x2b2   :  { %v225_v37 = vrot.slane %v223_v35, 4 }
 0x2b4   :  { %v227_v38 = vmax.f32 %v223_v35, %v225_v37 }
 0x2b6   :  { %v229_v39 = vsel %vm228_vm13, %v227_v38, 1.0 }
 0x2b7   :  { %351 = vmatmul.mubr.msk.f32.vlgmr.msra.gmra.mrb[2].mxu1 %vm232_vm14, %v229_v39 }
 0x38a   :  { %v306_v40 = vpop.f32.mrb[2].mxu1 }
 0x38b   :  { %311 = vst.msk [vmem:[%s435_s4] sm:$0xf] %vm310_vm15, %v306_v40  ;;  %v352_v41 = vpop.f32.mrb[3].mxu1 }

</bundles_post_ra>
